<compile_context>
chip_gen: v7x
topology: tpu7x:2x2x1
jax: 0.10.0
libtpu: 0.0.40
codegen_flags: <defaults>
</compile_context>

<pallas_src>
import jax
import jax.numpy as jnp
from jax.experimental import pallas as pl
from jax.experimental.pallas import tpu as pltpu

_LANE = 128
_SUBLANE = 8


def _round_up(x, m):
    return (x + m - 1) // m * m


def prepare_params(params, param_dtype=jnp.bfloat16):
    """One-time conversion of torch-style nn.Linear params [(W(out,in), b(out)), ...]
    into stacked kernel arguments (call once, outside the hot loop):
      w_stack: (L, P, P) param_dtype, W^T zero-padded, all layers share P.
      b_stack: (L, 1, P) f32, zero-padded biases.
    """
    dims = [(jnp.asarray(w).shape[1], jnp.asarray(w).shape[0]) for (w, _) in params]
    P = max(_round_up(d, _LANE) for pair in dims for d in pair)
    L = len(params)
    w_stack = jnp.zeros((L, P, P), jnp.float32)
    b_stack = jnp.zeros((L, 1, P), jnp.float32)
    for i, (w, b) in enumerate(params):
        w = jnp.asarray(w, jnp.float32)            # (out, in)
        b = jnp.asarray(b, jnp.float32)            # (out,)
        out_d, in_d = w.shape
        w_stack = w_stack.at[i, :in_d, :out_d].set(w.T)
        b_stack = b_stack.at[i, 0, :out_d].set(b)
    return {
        "w": w_stack.astype(param_dtype),
        "b": b_stack,
        "in_dim": dims[0][0],
        "out_dim": dims[-1][1],
        "feat_pad": P,
        "n_layers": L,
    }


def _build_kernel(n_layers, in_d, feat_pad, num_actions):
    def kernel(x_ref, w_ref, b_ref, out_ref, h0_ref):
        # Zero-fill the lane-padded activation tile entirely in VMEM
        # (no HBM traffic for the 120 padding lanes).
        if in_d < feat_pad:
            h0_ref[...] = jnp.zeros_like(h0_ref)
            h0_ref[:, :in_d] = x_ref[...]
        else:
            h0_ref[...] = x_ref[...]
        h = h0_ref[...]                                    # (TB, P) f32
        for i in range(n_layers):
            w = w_ref[i]                                   # (P, P) resident
            b = b_ref[i]                                   # (1, P) f32 resident
            h = jnp.dot(h.astype(w.dtype), w,
                        preferred_element_type=jnp.float32) + b
            if i < n_layers - 1:                           # ReLU between layers only
                h = jnp.maximum(h, 0.0)
        out_ref[...] = h[:, :num_actions].astype(out_ref.dtype)
    return kernel


def _jnp_forward(x, w_stack, b_stack, in_d, num_actions):
    """Plain-jnp path for tiny batches (same math as the kernel)."""
    B = x.shape[0]
    P = w_stack.shape[-1]
    h = x
    if in_d < P:
        h = jnp.concatenate([h, jnp.zeros((B, P - in_d), h.dtype)], axis=1)
    L = w_stack.shape[0]
    for i in range(L):
        h = jnp.dot(h.astype(w_stack.dtype), w_stack[i],
                    preferred_element_type=jnp.float32) + b_stack[i]
        if i < L - 1:
            h = jnp.maximum(h, 0.0)
    return h[:, :num_actions]


def dqn_mlp_forward(state, prepared, num_actions=None, *, tb=2048,
                    min_kernel_batch=64):
    """state: (B, input_size) f32.  prepared: output of prepare_params.
    Returns Q-values (B, num_actions) in f32."""
    state = jnp.asarray(state, jnp.float32)
    B, in_d = state.shape
    w_stack, b_stack = prepared["w"], prepared["b"]
    P = prepared["feat_pad"]
    L = prepared["n_layers"]
    if num_actions is None:
        num_actions = prepared["out_dim"]
    assert in_d == prepared["in_dim"], "state feature dim mismatch"
    assert num_actions <= P

    if B < min_kernel_batch:
        # TODO(synk): act()/eval path (B~1-2): kernel launch + DMA setup
        # dominates, plain jnp is cheaper.
        return _jnp_forward(state, w_stack, b_stack, in_d, num_actions)

    # Batch tiling: one grid step for typical DQN training batches (<= tb).
    # On v7x pass tb=round_up(B//2, 8) to get 2 parallel steps (both TCs).
    tb = max(_SUBLANE, _round_up(int(tb), _SUBLANE))
    n_steps = -(-B // tb)
    TB = _round_up(-(-B // n_steps), _SUBLANE)
    B_pad = _round_up(B, TB)
    x = state if B_pad == B else jnp.pad(state, ((0, B_pad - B), (0, 0)))

    kernel = _build_kernel(L, in_d, P, num_actions)

    # Rough VMEM footprint; only raise the scoped limit if we'd exceed the
    # 32 MiB default (v7x has 64 MiB physical VMEM per TC).
    w_bytes = int(w_stack.size) * jnp.dtype(w_stack.dtype).itemsize
    b_bytes = int(b_stack.size) * 4
    est = 2 * (w_bytes + b_bytes + TB * in_d * 4 + TB * num_actions * 4) \
        + 4 * TB * P * 4
    compiler_kwargs = dict(dimension_semantics=("parallel",))
    if est > (32 << 20):
        compiler_kwargs["vmem_limit_bytes"] = min(est + (16 << 20), 128 << 20)

    out = pl.pallas_call(
        kernel,
        out_shape=jax.ShapeDtypeStruct((B_pad, num_actions), jnp.float32),
        grid=(B_pad // TB,),
        in_specs=[
            # Batch tile streams; last block dim == full array dim (8), so no
            # lane-padded HBM copy of the input is ever materialized.
            pl.BlockSpec((TB, in_d), lambda i: (i, 0)),
            # Stacked weights / biases: constant index_map -> resident in VMEM.
            pl.BlockSpec((L, P, P), lambda i: (0, 0, 0)),
            pl.BlockSpec((L, 1, P), lambda i: (0, 0, 0)),
        ],
        out_specs=pl.BlockSpec((TB, num_actions), lambda i: (i, 0)),
        scratch_shapes=[pltpu.VMEM((TB, P), jnp.float32)],
        compiler_params=pltpu.CompilerParams(**compiler_kwargs),
    )(x, w_stack, b_stack)

    return out if B_pad == B else out[:B]


def make_params(key, layer_dims):
    """Deterministic synthetic init (stand-in for init_weights); torch-style
    (out, in) weight shapes."""
    params = []
    for i in range(len(layer_dims) - 1):
        fan_in, fan_out = layer_dims[i], layer_dims[i + 1]
        key, kw, kb = jax.random.split(key, 3)
        scale = 1.0 / jnp.sqrt(jnp.float32(fan_in))
        w = jax.random.uniform(kw, (fan_out, fan_in), jnp.float32, -scale, scale)
        b = jax.random.uniform(kb, (fan_out,), jnp.float32, -scale, scale)
        params.append((w, b))
    return params


def reference_forward(state, params):
    """Pure-JAX reference mirroring the PyTorch MLP forward, with the same
    bf16-inputs / f32-accumulate precision the kernel uses."""
    h = jnp.asarray(state, jnp.float32)
    n = len(params)
    for i, (w, b) in enumerate(params):
        w = jnp.asarray(w, jnp.float32)
        b = jnp.asarray(b, jnp.float32)
        h = jnp.dot(h.astype(jnp.bfloat16), w.T.astype(jnp.bfloat16),
                    preferred_element_type=jnp.float32) + b
        if i < n - 1:
            h = jnp.maximum(h, 0.0)
    return h


if __name__ == "__main__":
    # DQN_MLP_model(model_shape='small') -> layer_sizes = [16]*4
    # state_space.shape[0] = 8, num_actions = 4
    input_size = 8
    layer_sizes = [16] * 4          # model_shape == 'small'
    num_actions = 4
    layer_dims = [input_size] + layer_sizes + [num_actions]

    key = jax.random.PRNGKey(0)
    key, kx = jax.random.split(key)
    params = make_params(key, layer_dims)
    prepared = prepare_params(params)            # one-time, outside hot path

    # 1) Eval-sized batch (B=2): force the kernel path to exercise it.
    state_small = jax.random.normal(kx, (2, input_size), jnp.float32)
    q_small = dqn_mlp_forward(state_small, prepared, num_actions,
                              min_kernel_batch=1)
    jax.block_until_ready(q_small)
    ref_small = reference_forward(state_small, params)
    assert q_small.shape == (2, num_actions)
    assert jnp.allclose(q_small, ref_small, atol=1e-4, rtol=1e-4), \
        "kernel (B=2) mismatch vs reference"

    # 2) Training-sized batch: default path -> kernel, single grid step.
    key, kx2 = jax.random.split(key)
    state_train = jax.random.normal(kx2, (256, input_size), jnp.float32)
    q_train = dqn_mlp_forward(state_train, prepared, num_actions)
    jax.block_until_ready(q_train)
    ref_train = reference_forward(state_train, params)
    assert q_train.shape == (256, num_actions)
    assert jnp.allclose(q_train, ref_train, atol=1e-4, rtol=1e-4), \
        "kernel (B=256) mismatch vs reference"

    # 3) Tiny-batch jnp fallback (default min_kernel_batch=64 gates B=2).
    q_fb = dqn_mlp_forward(state_small, prepared, num_actions)
    assert jnp.allclose(q_fb, ref_small, atol=1e-4, rtol=1e-4), \
        "jnp fallback mismatch vs reference"

    print("KERNEL_OK")
</pallas_src>

<mosaic_0001>
module attributes {stable_mosaic.version = 11 : i64} {
  func.func @kernel(%arg0: i32, %arg1: memref<8x8xf32, #tpu.memory_space<vmem>>, %arg2: memref<5x128x128xbf16, #tpu.memory_space<vmem>>, %arg3: memref<5x1x128xf32, #tpu.memory_space<vmem>>, %arg4: memref<8x4xf32, #tpu.memory_space<vmem>>, %arg5: memref<8x128xf32, #tpu.memory_space<vmem>>) attributes {dimension_semantics = [#tpu.dimension_semantics<parallel>], iteration_bounds = array<i64: 1>, scalar_prefetch = 0 : i64, scratch_operands = 1 : i64, tpu.core_type = #tpu.core_type<tc>, window_params = [{transform_indices = @transform_0, window_bounds = array<i64: 8, 8>}, {pipeline_mode = #tpu.pipeline_mode<synchronous>, transform_indices = @transform_1, window_bounds = array<i64: 5, 128, 128>}, {pipeline_mode = #tpu.pipeline_mode<synchronous>, transform_indices = @transform_2, window_bounds = array<i64: 5, 1, 128>}, {transform_indices = @transform_3, window_bounds = array<i64: 8, 4>}]} {
    %cst = arith.constant 0.000000e+00 : f32
    %0 = vector.broadcast %cst : f32 to vector<8x128xf32>
    %c0 = arith.constant 0 : index
    %c0_0 = arith.constant 0 : index
    %1 = vector.load %arg5[%c0, %c0_0] : memref<8x128xf32, #tpu.memory_space<vmem>>, vector<8x128xf32>
    tpu.vector_store %arg5[%c0, %c0_0], %0 {strides = array<i32>} : memref<8x128xf32, #tpu.memory_space<vmem>>, vector<8x128xf32>,
    %c0_1 = arith.constant 0 : index
    %c0_2 = arith.constant 0 : index
    %2 = vector.load %arg1[%c0_1, %c0_2] : memref<8x8xf32, #tpu.memory_space<vmem>>, vector<8x8xf32>
    %c0_3 = arith.constant 0 : index
    %c0_4 = arith.constant 0 : index
    %3 = vector.load %arg5[%c0_3, %c0_4] : memref<8x128xf32, #tpu.memory_space<vmem>>, vector<8x8xf32>
    tpu.vector_store %arg5[%c0_3, %c0_4], %2 {strides = array<i32>} : memref<8x128xf32, #tpu.memory_space<vmem>>, vector<8x8xf32>,
    %c0_5 = arith.constant 0 : index
    %c0_6 = arith.constant 0 : index
    %4 = vector.load %arg5[%c0_5, %c0_6] : memref<8x128xf32, #tpu.memory_space<vmem>>, vector<8x128xf32>
    %c0_7 = arith.constant 0 : index
    %c0_8 = arith.constant 0 : index
    %c0_9 = arith.constant 0 : index
    %5 = vector.load %arg2[%c0_7, %c0_8, %c0_9] : memref<5x128x128xbf16, #tpu.memory_space<vmem>>, vector<1x128x128xbf16>
    %6 = vector.shape_cast %5 : vector<1x128x128xbf16> to vector<128x128xbf16>
    %c0_10 = arith.constant 0 : index
    %c0_11 = arith.constant 0 : index
    %c0_12 = arith.constant 0 : index
    %7 = vector.load %arg3[%c0_10, %c0_11, %c0_12] : memref<5x1x128xf32, #tpu.memory_space<vmem>>, vector<1x1x128xf32>
    %8 = vector.shape_cast %7 : vector<1x1x128xf32> to vector<1x128xf32>
    %9 = arith.truncf %4 : vector<8x128xf32> to vector<8x128xbf16>
    %cst_13 = arith.constant dense<0.000000e+00> : vector<8x128xf32>
    %10 = tpu.matmul %9, %6, %cst_13 {dimension_numbers = #tpu.dot_dimension_numbers<[1], [0], [0], [1], [0, 0, 1, 1], [], []>} : vector<8x128xbf16>, vector<128x128xbf16>, vector<8x128xf32> -> vector<8x128xf32>
    %11 = vector.broadcast %8 : vector<1x128xf32> to vector<8x128xf32>
    %12 = arith.addf %10, %11 : vector<8x128xf32>
    %cst_14 = arith.constant 0.000000e+00 : f32
    %13 = vector.broadcast %cst_14 : f32 to vector<8x128xf32>
    %14 = arith.maximumf %12, %13 : vector<8x128xf32>
    %c1 = arith.constant 1 : index
    %c0_15 = arith.constant 0 : index
    %c0_16 = arith.constant 0 : index
    %15 = vector.load %arg2[%c1, %c0_15, %c0_16] : memref<5x128x128xbf16, #tpu.memory_space<vmem>>, vector<1x128x128xbf16>
    %16 = vector.shape_cast %15 : vector<1x128x128xbf16> to vector<128x128xbf16>
    %c1_17 = arith.constant 1 : index
    %c0_18 = arith.constant 0 : index
    %c0_19 = arith.constant 0 : index
    %17 = vector.load %arg3[%c1_17, %c0_18, %c0_19] : memref<5x1x128xf32, #tpu.memory_space<vmem>>, vector<1x1x128xf32>
    %18 = vector.shape_cast %17 : vector<1x1x128xf32> to vector<1x128xf32>
    %19 = arith.truncf %14 : vector<8x128xf32> to vector<8x128xbf16>
    %cst_20 = arith.constant dense<0.000000e+00> : vector<8x128xf32>
    %20 = tpu.matmul %19, %16, %cst_20 {dimension_numbers = #tpu.dot_dimension_numbers<[1], [0], [0], [1], [0, 0, 1, 1], [], []>} : vector<8x128xbf16>, vector<128x128xbf16>, vector<8x128xf32> -> vector<8x128xf32>
    %21 = vector.broadcast %18 : vector<1x128xf32> to vector<8x128xf32>
    %22 = arith.addf %20, %21 : vector<8x128xf32>
    %cst_21 = arith.constant 0.000000e+00 : f32
    %23 = vector.broadcast %cst_21 : f32 to vector<8x128xf32>
    %24 = arith.maximumf %22, %23 : vector<8x128xf32>
    %c2 = arith.constant 2 : index
    %c0_22 = arith.constant 0 : index
    %c0_23 = arith.constant 0 : index
    %25 = vector.load %arg2[%c2, %c0_22, %c0_23] : memref<5x128x128xbf16, #tpu.memory_space<vmem>>, vector<1x128x128xbf16>
    %26 = vector.shape_cast %25 : vector<1x128x128xbf16> to vector<128x128xbf16>
    %c2_24 = arith.constant 2 : index
    %c0_25 = arith.constant 0 : index
    %c0_26 = arith.constant 0 : index
    %27 = vector.load %arg3[%c2_24, %c0_25, %c0_26] : memref<5x1x128xf32, #tpu.memory_space<vmem>>, vector<1x1x128xf32>
    %28 = vector.shape_cast %27 : vector<1x1x128xf32> to vector<1x128xf32>
    %29 = arith.truncf %24 : vector<8x128xf32> to vector<8x128xbf16>
    %cst_27 = arith.constant dense<0.000000e+00> : vector<8x128xf32>
    %30 = tpu.matmul %29, %26, %cst_27 {dimension_numbers = #tpu.dot_dimension_numbers<[1], [0], [0], [1], [0, 0, 1, 1], [], []>} : vector<8x128xbf16>, vector<128x128xbf16>, vector<8x128xf32> -> vector<8x128xf32>
    %31 = vector.broadcast %28 : vector<1x128xf32> to vector<8x128xf32>
    %32 = arith.addf %30, %31 : vector<8x128xf32>
    %cst_28 = arith.constant 0.000000e+00 : f32
    %33 = vector.broadcast %cst_28 : f32 to vector<8x128xf32>
    %34 = arith.maximumf %32, %33 : vector<8x128xf32>
    %c3 = arith.constant 3 : index
    %c0_29 = arith.constant 0 : index
    %c0_30 = arith.constant 0 : index
    %35 = vector.load %arg2[%c3, %c0_29, %c0_30] : memref<5x128x128xbf16, #tpu.memory_space<vmem>>, vector<1x128x128xbf16>
    %36 = vector.shape_cast %35 : vector<1x128x128xbf16> to vector<128x128xbf16>
    %c3_31 = arith.constant 3 : index
    %c0_32 = arith.constant 0 : index
    %c0_33 = arith.constant 0 : index
    %37 = vector.load %arg3[%c3_31, %c0_32, %c0_33] : memref<5x1x128xf32, #tpu.memory_space<vmem>>, vector<1x1x128xf32>
    %38 = vector.shape_cast %37 : vector<1x1x128xf32> to vector<1x128xf32>
    %39 = arith.truncf %34 : vector<8x128xf32> to vector<8x128xbf16>
    %cst_34 = arith.constant dense<0.000000e+00> : vector<8x128xf32>
    %40 = tpu.matmul %39, %36, %cst_34 {dimension_numbers = #tpu.dot_dimension_numbers<[1], [0], [0], [1], [0, 0, 1, 1], [], []>} : vector<8x128xbf16>, vector<128x128xbf16>, vector<8x128xf32> -> vector<8x128xf32>
    %41 = vector.broadcast %38 : vector<1x128xf32> to vector<8x128xf32>
    %42 = arith.addf %40, %41 : vector<8x128xf32>
    %cst_35 = arith.constant 0.000000e+00 : f32
    %43 = vector.broadcast %cst_35 : f32 to vector<8x128xf32>
    %44 = arith.maximumf %42, %43 : vector<8x128xf32>
    %c4 = arith.constant 4 : index
    %c0_36 = arith.constant 0 : index
    %c0_37 = arith.constant 0 : index
    %45 = vector.load %arg2[%c4, %c0_36, %c0_37] : memref<5x128x128xbf16, #tpu.memory_space<vmem>>, vector<1x128x128xbf16>
    %46 = vector.shape_cast %45 : vector<1x128x128xbf16> to vector<128x128xbf16>
    %c4_38 = arith.constant 4 : index
    %c0_39 = arith.constant 0 : index
    %c0_40 = arith.constant 0 : index
    %47 = vector.load %arg3[%c4_38, %c0_39, %c0_40] : memref<5x1x128xf32, #tpu.memory_space<vmem>>, vector<1x1x128xf32>
    %48 = vector.shape_cast %47 : vector<1x1x128xf32> to vector<1x128xf32>
    %49 = arith.truncf %44 : vector<8x128xf32> to vector<8x128xbf16>
    %cst_41 = arith.constant dense<0.000000e+00> : vector<8x128xf32>
    %50 = tpu.matmul %49, %46, %cst_41 {dimension_numbers = #tpu.dot_dimension_numbers<[1], [0], [0], [1], [0, 0, 1, 1], [], []>} : vector<8x128xbf16>, vector<128x128xbf16>, vector<8x128xf32> -> vector<8x128xf32>
    %51 = vector.broadcast %48 : vector<1x128xf32> to vector<8x128xf32>
    %52 = arith.addf %50, %51 : vector<8x128xf32>
    %53 = vector.extract_strided_slice %52 {offsets = [0, 0], sizes = [8, 4], strides = [1, 1]} : vector<8x128xf32> to vector<8x4xf32>
    %c0_42 = arith.constant 0 : index
    %c0_43 = arith.constant 0 : index
    %54 = vector.load %arg4[%c0_42, %c0_43] : memref<8x4xf32, #tpu.memory_space<vmem>>, vector<8x4xf32>
    tpu.vector_store %arg4[%c0_42, %c0_43], %53 {strides = array<i32>} : memref<8x4xf32, #tpu.memory_space<vmem>>, vector<8x4xf32>,
    return
  }
  func.func @transform_0(%arg0: i32) -> (i32, i32) {
    %c0_i32 = arith.constant 0 : i32
    %c0_i32_0 = arith.constant 0 : i32
    return %arg0, %c0_i32 : i32, i32
  }
  func.func @transform_1(%arg0: i32) -> (i32, i32, i32) {
    %c0_i32 = arith.constant 0 : i32
    %c0_i32_0 = arith.constant 0 : i32
    %c0_i32_1 = arith.constant 0 : i32
    %c0_i32_2 = arith.constant 0 : i32
    return %c0_i32, %c0_i32_0, %c0_i32_1 : i32, i32, i32
  }
  func.func @transform_2(%arg0: i32) -> (i32, i32, i32) {
    %c0_i32 = arith.constant 0 : i32
    %c0_i32_0 = arith.constant 0 : i32
    %c0_i32_1 = arith.constant 0 : i32
    %c0_i32_2 = arith.constant 0 : i32
    return %c0_i32, %c0_i32_0, %c0_i32_1 : i32, i32, i32
  }
  func.func @transform_3(%arg0: i32) -> (i32, i32) {
    %c0_i32 = arith.constant 0 : i32
    %c0_i32_0 = arith.constant 0 : i32
    return %arg0, %c0_i32 : i32, i32
  }
}

</mosaic_0001>

<bundles_post_ra>
// kernel: tpu_custom_call.1
= control target key start
LH: loop header
LB: loop body
LE: loop exit
PB: predicated region body
PF: predicated region fallthrough
CT: control target
= control target key end

     0   :  { %8 = vsyncpa [#allocation4], 0  ;;  %s1040_s0 = inlined_call_operand.hbm [shape: f32[8,8], index: 0, kind: input, shape index: {}]   ;;  %s1041_s1 = inlined_call_operand.hbm [shape: bf16[5,128,128], index: 1, kind: input, shape index: {}]   ;;  %s1042_s2 = inlined_call_operand.vmem [shape: f32[5,1,128], index: 2, kind: input, shape index: {}]   ;;  %s1043_s3 = inlined_call_operand.vmem [shape: f32[8,4], index: 3, kind: output, shape index: {}]  }
   0x1   :  { %9 = vsyncpa [#allocation6], 0  ;;  %s914_s12 = smov [#allocation3]   ;;  %s915_s14 = smov [#allocation5]  }
   0x2   :  { %s16_s13 = sshll.u32 %s914_s12, 4  ;;  %s25_s15 = sshll.u32 %s915_s14, 4  ;;  %s17_s13 = int_to_ptr.vmem [resolvable:$true] %s16_s13  ;;  %s940_s15 = int_to_ptr.vmem [resolvable:$true] %s25_s15 }
   0x3   :  { %s866_s18 = scalar_lea.hbm %s1040_s0, 128 }
   0x4   :  { %p867_p0 = scmp.ne.s32.totalorder %s1040_s0, %s866_s18  ;;  %p870_p1 = scmp.lt.u32.totalorder %s866_s18, %s1040_s0 }
   0x6   :  { %p872_p2 = pnand %p870_p1, %p867_p0 }
   0x8   :  { %875 = shalt.err (!%p872_p2)
}
   0x9   :  { %s876_s23 = scalar_lea.vmem %s17_s13, 128  ;;  %p881_p4 = scmp.lt.s32.totalorder %s17_s13, %s17_s13 }
   0xa   :  { %p877_p3 = scmp.ne.s32.totalorder %s17_s13, %s876_s23  ;;  %p882_p5 = scmp.lt.s32.totalorder %s876_s23, %s876_s23 }
   0xc   :  { %p883_p6 = por %p882_p5, %p881_p4 }
   0xe   :  { %p884_p7 = pnand %p883_p6, %p877_p3 }
  0x10   :  { %887 = shalt.err (!%p884_p7)
}
  0x11   :  { %19 = dma.hbm_to_vmem [thread:$0]  %s1040_s0, 128, %s17_s13, [#allocation4]  }
  0x12   :  { %s888_s28 = scalar_lea.hbm %s1041_s1, 5120 }
  0x13   :  { %p889_p8 = scmp.ne.s32.totalorder %s1041_s1, %s888_s28  ;;  %p892_p9 = scmp.lt.u32.totalorder %s888_s28, %s1041_s1 }
  0x15   :  { %p894_p10 = pnand %p892_p9, %p889_p8 }
  0x17   :  { %897 = shalt.err (!%p894_p10)
}
  0x18   :  { %s898_s6 = scalar_lea.vmem %s940_s15, 5120  ;;  %p903_p12 = scmp.lt.s32.totalorder %s940_s15, %s940_s15 }
  0x19   :  { %p899_p11 = scmp.ne.s32.totalorder %s940_s15, %s898_s6  ;;  %p904_p13 = scmp.lt.s32.totalorder %s898_s6, %s898_s6 }
  0x1b   :  { %p905_p0 = por %p904_p13, %p903_p12 }
  0x1d   :  { %p906_p1 = pnand %p905_p0, %p899_p11 }
  0x1f   :  { %909 = shalt.err (!%p906_p1)
}
  0x20   :  { %s916_s0 = smov 64   ;;  %s917_s7 = smov 4  }
  0x21   :  { %31 = dma.hbm_to_vmem [thread:$0]  %s1041_s1, 5120, %s940_s15, [#allocation6], %s916_s0, %s916_s0, %s917_s7  }
  0x22   :  { %910 = dma.done.wait [#allocation4], 128  }
  0x23   :  { %911 = vsyncadd [#allocation4], 4294967168 }
  0x24   :  { %912 = dma.done.wait [#allocation6], 5120  }
  0x25   :  { %913 = vsyncadd [#allocation6], 4294962176  ;;  %v918_v0 = vmov 0.0   ;;  %vm919_vm0 = vmmov 0   ;;  %v826_v1 = vld [vmem:[#allocation5] sm:$0xff]   ;;  %v827_v2 = vld [vmem:[#allocation5 + $0x8] sm:$0xff]  }
  0x26   :  { %720 = vmatprep.subr.bf16.mxu0 %v918_v0  ;;  %41 = vst [vmem:[#allocation2] sm:$0xff] %v918_v0  ;;  %736 = vmatprep.mubr.msk.bf16.mxu0 %vm919_vm0, %v918_v0  ;;  %v828_v3 = vld [vmem:[#allocation5 + $0x10] sm:$0xff]   ;;  %vm43_vm1 = vcmask 64512   ;;  %v42_v4 = vld [vmem:[#allocation3] sm:$0xff]  ;;  %v834_v5 = vld [vmem:[#allocation5 + $0x40] sm:$0xff]   ;;  %vm618_vm2 = vcmask 31744  }
  0x27   :  { %740 = vmatprep.subr.bf16.mxu1 %v918_v0  ;;  %756 = vmatprep.mubr.msk.bf16.mxu1 %vm919_vm0, %v918_v0  ;;  %44 = vst.msk [vmem:[#allocation2] sm:$0xff] %vm43_vm1, %v42_v4  ;;  %v829_v6 = vld [vmem:[#allocation5 + $0x18] sm:$0xff]   ;;  %v835_v7 = vld [vmem:[#allocation5 + $0x48] sm:$0xff]   ;;  %v830_v8 = vld [vmem:[#allocation5 + $0x20] sm:$0xff]  }
  0x28   :  { %721 = vmatpush3.bf16.msra.mxu0 %v826_v1  ;;  %741 = vmatpush3.bf16.msra.mxu1 %v834_v5  ;;  %v836_v9 = vld [vmem:[#allocation5 + $0x50] sm:$0xff]   ;;  %v831_v10 = vld [vmem:[#allocation5 + $0x28] sm:$0xff]   ;;  %v837_v11 = vld [vmem:[#allocation5 + $0x58] sm:$0xff]  }
  0x29   :  { %722 = vmatprep.subr.bf16.mxu0 %v918_v0  ;;  %742 = vmatprep.subr.bf16.mxu1 %v918_v0  ;;  %v832_v12 = vld [vmem:[#allocation5 + $0x30] sm:$0xff]   ;;  %v838_v13 = vld [vmem:[#allocation5 + $0x60] sm:$0xff]   ;;  %v833_v14 = vld [vmem:[#allocation5 + $0x38] sm:$0xff]  }
  0x2a   :  { %v839_v16 = vld [vmem:[#allocation5 + $0x68] sm:$0xff]   ;;  %v840_v18 = vld [vmem:[#allocation5 + $0x70] sm:$0xff]   ;;  %v841_v19 = vld [vmem:[#allocation5 + $0x78] sm:$0xff]  }
  0x2b   :  { %v842_v20 = vld [vmem:[#allocation5 + $0x80] sm:$0xff]   ;;  %v843_v21 = vld [vmem:[#allocation5 + $0x88] sm:$0xff]   ;;  %v844_v22 = vld [vmem:[#allocation5 + $0x90] sm:$0xff]  }
  0x2c   :  { %723 = vmatpush3.bf16.msra.mxu0 %v827_v2  ;;  %743 = vmatpush3.bf16.msra.mxu1 %v835_v7  ;;  %v845_v23 = vld [vmem:[#allocation5 + $0x98] sm:$0xff]   ;;  %v846_v24 = vld [vmem:[#allocation5 + $0xa0] sm:$0xff]   ;;  %v847_v25 = vld [vmem:[#allocation5 + $0xa8] sm:$0xff]  }
  0x2d   :  { %724 = vmatprep.subr.bf16.mxu0 %v918_v0  ;;  %744 = vmatprep.subr.bf16.mxu1 %v918_v0  ;;  %v626_v26 = vld [vmem:[%s1042_s2] ss:$0 sm:$0xff]  ;;  %v848_v34 = vld [vmem:[#allocation5 + $0xb0] sm:$0xff]   ;;  %v849_v35 = vld [vmem:[#allocation5 + $0xb8] sm:$0xff]  }
  0x2e   :  { %v45_v15 = vld [vmem:[#allocation2] sm:$0xff]  ;;  %v850_v36 = vld [vmem:[#allocation5 + $0xc0] sm:$0xff]   ;;  %v851_v37 = vld [vmem:[#allocation5 + $0xc8] sm:$0xff]  }
  0x2f   :  { %v63_v17 = vpack.c.bf16 %v45_v15, %v45_v15  ;;  %v852_v38 = vld [vmem:[#allocation5 + $0xd0] sm:$0xff]   ;;  %v853_v39 = vld [vmem:[#allocation5 + $0xd8] sm:$0xff]   ;;  %v854_v40 = vld [vmem:[#allocation5 + $0xe0] sm:$0xff]  }
  0x30   :  { %725 = vmatpush3.bf16.msra.mxu0 %v828_v3  ;;  %745 = vmatpush3.bf16.msra.mxu1 %v836_v9  ;;  %v855_v41 = vld [vmem:[#allocation5 + $0xe8] sm:$0xff]   ;;  %v856_v50 = vld [vmem:[#allocation5 + $0xf0] sm:$0xff]   ;;  %v857_v51 = vld [vmem:[#allocation5 + $0xf8] sm:$0xff]  }
  0x31   :  { %726 = vmatprep.subr.bf16.mxu0 %v918_v0  ;;  %746 = vmatprep.subr.bf16.mxu1 %v918_v0  ;;  %v636_v42 = vld [vmem:[%s1042_s2 + $0x1] ss:$0 sm:$0xff]  ;;  %v858_v52 = vld [vmem:[#allocation5 + $0x100] sm:$0xff]   ;;  %v860_v54 = vld [vmem:[#allocation5 + $0x110] sm:$0xff]  }
  0x32   :  { %v859_v53 = vld [vmem:[#allocation5 + $0x108] sm:$0xff]   ;;  %v861_v55 = vld [vmem:[#allocation5 + $0x118] sm:$0xff]   ;;  %v862_v56 = vld [vmem:[#allocation5 + $0x120] sm:$0xff]  }
  0x33   :  { %v863_v57 = vld [vmem:[#allocation5 + $0x128] sm:$0xff]   ;;  %v864_v3 = vld [vmem:[#allocation5 + $0x130] sm:$0xff]   ;;  %v865_v4 = vld [vmem:[#allocation5 + $0x138] sm:$0xff]  }
  0x34   :  { %727 = vmatpush3.bf16.msra.mxu0 %v829_v6  ;;  %747 = vmatpush3.bf16.msra.mxu1 %v837_v11  ;;  %v646_v58 = vld [vmem:[%s1042_s2 + $0x2] ss:$0 sm:$0xff]  ;;  %v656_v5 = vld [vmem:[%s1042_s2 + $0x3] ss:$0 sm:$0xff] }
  0x35   :  { %728 = vmatprep.subr.bf16.mxu0 %v918_v0  ;;  %748 = vmatprep.subr.bf16.mxu1 %v918_v0 }
  0x38   :  { %729 = vmatpush3.bf16.msra.mxu0 %v830_v8  ;;  %749 = vmatpush3.bf16.msra.mxu1 %v838_v13  ;;  %v666_v13 = vld [vmem:[%s1042_s2 + $0x4] ss:$0 sm:$0xff] }
  0x39   :  { %730 = vmatprep.subr.bf16.mxu0 %v918_v0  ;;  %750 = vmatprep.subr.bf16.mxu1 %v918_v0 }
  0x3c   :  { %731 = vmatpush3.bf16.msra.mxu0 %v831_v10  ;;  %751 = vmatpush3.bf16.msra.mxu1 %v839_v16 }
  0x3d   :  { %732 = vmatprep.subr.bf16.mxu0 %v918_v0  ;;  %752 = vmatprep.subr.bf16.mxu1 %v918_v0 }
  0x40   :  { %733 = vmatpush3.bf16.msra.mxu0 %v832_v12  ;;  %753 = vmatpush3.bf16.msra.mxu1 %v840_v18 }
  0x41   :  { %734 = vmatprep.subr.bf16.mxu0 %v918_v0  ;;  %754 = vmatprep.subr.bf16.mxu1 %v918_v0 }
  0x44   :  { %735 = vmatpush3.bf16.msra.mxu0 %v833_v14  ;;  %755 = vmatpush3.bf16.msra.mxu1 %v841_v19 }
  0x45   :  { %760 = vmatprep.subr.bf16.mxu0 %v918_v0  ;;  %780 = vmatprep.subr.bf16.mxu1 %v918_v0 }
  0x47   :  { %737 = vmatmul.mubr.bf16.vlgmr.msra.gmra.mrb[0].mxu0 %v63_v17 }
  0x48   :  { %776 = vmatprep.mubr.msk.bf16.mxu0 %vm919_vm0, %v918_v0  ;;  %761 = vmatpush3.bf16.msra.mxu0 %v842_v20 }
  0x49   :  { %762 = vmatprep.subr.bf16.mxu0 %v918_v0 }
  0x4c   :  { %763 = vmatpush3.bf16.msra.mxu0 %v843_v21 }
  0x4d   :  { %764 = vmatprep.subr.bf16.mxu0 %v918_v0 }
  0x50   :  { %765 = vmatpush3.bf16.msra.mxu0 %v844_v22 }
  0x51   :  { %766 = vmatprep.subr.bf16.mxu0 %v918_v0 }
  0x54   :  { %767 = vmatpush3.bf16.msra.mxu0 %v845_v23 }
  0x55   :  { %768 = vmatprep.subr.bf16.mxu0 %v918_v0 }
  0x58   :  { %769 = vmatpush3.bf16.msra.mxu0 %v846_v24 }
  0x59   :  { %770 = vmatprep.subr.bf16.mxu0 %v918_v0 }
  0x5c   :  { %771 = vmatpush3.bf16.msra.mxu0 %v847_v25 }
  0x5d   :  { %772 = vmatprep.subr.bf16.mxu0 %v918_v0 }
  0x60   :  { %773 = vmatpush3.bf16.msra.mxu0 %v848_v34 }
  0x61   :  { %774 = vmatprep.subr.bf16.mxu0 %v918_v0 }
  0x64   :  { %775 = vmatpush3.bf16.msra.mxu0 %v849_v35 }
  0x65   :  { %800 = vmatprep.subr.bf16.mxu0 %v918_v0 }
 0x11a   :  { %v152_v27 = vpop.f32.mrb[0].mxu0 }
 0x11b   :  { %v153_v28 = vadd.f32 %v626_v26, %v152_v27  ;;  %v738_v29 = vpop.f32.mrb[1].mxu0 }
 0x11c   :  { %v155_v30 = vpop.f32.mrb[2].mxu0 }
 0x11d   :  { %v158_v31 = vmax.f32 %v153_v28, 0.0  ;;  %v739_v32 = vpop.f32.mrb[3].mxu0 }
 0x11f   :  { %v178_v33 = vpack.c.bf16 %v158_v31, %v158_v31 }
 0x121   :  { %757 = vmatmul.mubr.bf16.vlgmr.msra.gmra.mrb[0].mxu1 %v178_v33 }
 0x122   :  { %796 = vmatprep.mubr.msk.bf16.mxu1 %vm919_vm0, %v918_v0  ;;  %781 = vmatpush3.bf16.msra.mxu1 %v850_v36 }
 0x123   :  { %782 = vmatprep.subr.bf16.mxu1 %v918_v0 }
 0x126   :  { %783 = vmatpush3.bf16.msra.mxu1 %v851_v37 }
 0x127   :  { %784 = vmatprep.subr.bf16.mxu1 %v918_v0 }
 0x12a   :  { %785 = vmatpush3.bf16.msra.mxu1 %v852_v38 }
 0x12b   :  { %786 = vmatprep.subr.bf16.mxu1 %v918_v0 }
 0x12e   :  { %787 = vmatpush3.bf16.msra.mxu1 %v853_v39 }
 0x12f   :  { %788 = vmatprep.subr.bf16.mxu1 %v918_v0 }
 0x132   :  { %789 = vmatpush3.bf16.msra.mxu1 %v854_v40 }
 0x133   :  { %790 = vmatprep.subr.bf16.mxu1 %v918_v0 }
 0x136   :  { %791 = vmatpush3.bf16.msra.mxu1 %v855_v41 }
 0x137   :  { %792 = vmatprep.subr.bf16.mxu1 %v918_v0 }
 0x13a   :  { %793 = vmatpush3.bf16.msra.mxu1 %v856_v50 }
 0x13b   :  { %794 = vmatprep.subr.bf16.mxu1 %v918_v0 }
 0x13e   :  { %795 = vmatpush3.bf16.msra.mxu1 %v857_v51 }
 0x1f4   :  { %v267_v43 = vpop.f32.mrb[0].mxu1 }
 0x1f5   :  { %v268_v44 = vadd.f32 %v636_v42, %v267_v43  ;;  %v758_v45 = vpop.f32.mrb[1].mxu1 }
 0x1f6   :  { %v270_v46 = vpop.f32.mrb[2].mxu1 }
 0x1f7   :  { %v273_v47 = vmax.f32 %v268_v44, 0.0  ;;  %v759_v48 = vpop.f32.mrb[3].mxu1 }
 0x1f9   :  { %v293_v49 = vpack.c.bf16 %v273_v47, %v273_v47 }
 0x1fb   :  { %777 = vmatmul.mubr.bf16.vlgmr.msra.gmra.mrb[4].mxu0 %v293_v49 }
 0x1fc   :  { %816 = vmatprep.mubr.msk.bf16.mxu0 %vm919_vm0, %v918_v0  ;;  %801 = vmatpush3.bf16.msra.mxu0 %v858_v52 }
 0x1fd   :  { %802 = vmatprep.subr.bf16.mxu0 %v918_v0 }
 0x200   :  { %803 = vmatpush3.bf16.msra.mxu0 %v859_v53 }
 0x201   :  { %804 = vmatprep.subr.bf16.mxu0 %v918_v0 }
 0x204   :  { %805 = vmatpush3.bf16.msra.mxu0 %v860_v54 }
 0x205   :  { %806 = vmatprep.subr.bf16.mxu0 %v918_v0 }
 0x208   :  { %807 = vmatpush3.bf16.msra.mxu0 %v861_v55 }
 0x209   :  { %808 = vmatprep.subr.bf16.mxu0 %v918_v0 }
 0x20c   :  { %809 = vmatpush3.bf16.msra.mxu0 %v862_v56 }
 0x20d   :  { %810 = vmatprep.subr.bf16.mxu0 %v918_v0 }
 0x210   :  { %811 = vmatpush3.bf16.msra.mxu0 %v863_v57 }
 0x211   :  { %812 = vmatprep.subr.bf16.mxu0 %v918_v0 }
 0x214   :  { %813 = vmatpush3.bf16.msra.mxu0 %v864_v3 }
 0x215   :  { %814 = vmatprep.subr.bf16.mxu0 %v918_v0 }
 0x218   :  { %815 = vmatpush3.bf16.msra.mxu0 %v865_v4 }
 0x2ce   :  { %v382_v59 = vpop.f32.mrb[4].mxu0 }
 0x2cf   :  { %v383_v60 = vadd.f32 %v646_v58, %v382_v59  ;;  %v778_v61 = vpop.f32.mrb[5].mxu0 }
 0x2d0   :  { %v385_v62 = vpop.f32.mrb[6].mxu0 }
 0x2d1   :  { %v388_v63 = vmax.f32 %v383_v60, 0.0  ;;  %v779_v1 = vpop.f32.mrb[7].mxu0 }
 0x2d3   :  { %v408_v2 = vpack.c.bf16 %v388_v63, %v388_v63 }
 0x2d5   :  { %797 = vmatmul.mubr.bf16.vlgmr.msra.gmra.mrb[4].mxu1 %v408_v2 }
 0x3a8   :  { %v497_v6 = vpop.f32.mrb[4].mxu1 }
 0x3a9   :  { %v498_v7 = vadd.f32 %v656_v5, %v497_v6  ;;  %v798_v8 = vpop.f32.mrb[5].mxu1 }
 0x3aa   :  { %v500_v9 = vpop.f32.mrb[6].mxu1 }
 0x3ab   :  { %v503_v10 = vmax.f32 %v498_v7, 0.0  ;;  %v799_v11 = vpop.f32.mrb[7].mxu1 }
 0x3ad   :  { %v523_v12 = vpack.c.bf16 %v503_v10, %v503_v10 }
 0x3af   :  { %817 = vmatmul.mubr.bf16.vlgmr.msra.gmra.mrb[8].mxu0 %v523_v12 }
 0x482   :  { %v612_v14 = vpop.f32.mrb[8].mxu0 }
 0x483   :  { %v613_v0 = vadd.f32 %v666_v13, %v612_v14  ;;  %v818_v15 = vpop.f32.mrb[9].mxu0 }
 0x484   :  { %v615_v16 = vpop.f32.mrb[10].mxu0 }
 0x485   :  { %619 = vst.msk [vmem:[%s1043_s3] sm:$0xff] %vm618_vm2, %v613_v0  ;;  %v819_v17 = vpop.f32.mrb[11].mxu0 }
 0x486   :  { %624 = vsyncpa [#allocation4], 1 }
 0x487   :  { %625 = vsyncpa [#allocation6], 1 }

</bundles_post_ra>
